<compile_context>
chip_gen: v5e
topology: v5e:2x2
jax: 0.10.0
libtpu: 0.0.40
codegen_flags: <defaults>
</compile_context>

<pallas_src>
import functools

import jax
import jax.numpy as jnp
from jax.experimental import pallas as pl
from jax.experimental.pallas import tpu as pltpu


def _round_up(n, m):
    return ((n + m - 1) // m) * m


def _sfda_linear_kernel(x_ref, w_ref, b_ref, o_ref):
    # Plain matmul + bias: the weight-norm scaling is already folded into w.
    y = jnp.dot(x_ref[...], w_ref[...], preferred_element_type=jnp.float32)
    o_ref[...] = (y + b_ref[...].astype(jnp.float32)).astype(o_ref.dtype)


@functools.partial(jax.jit, static_argnames=("mxu_dtype",))
def sfda_classifier_forward(x, v, g, b, *, mxu_dtype=None):
    """Weight-normalized linear forward (SFDAClassifier.forward).

    x: [B, D], v: [C, D], g: [C, 1], b: [C] -> [B, C]
    mxu_dtype: optional dtype (e.g. jnp.bfloat16) for the matmul inputs; the
               accumulation stays f32.
    """
    B, D = x.shape
    C, _ = v.shape
    out_dtype = x.dtype

    # --- Hoisted weight-norm (computed once by XLA, not per kernel tile). ---
    # NOTE: matches torch weight_norm exactly (no epsilon); an all-zero row of
    # v would give inf/NaN here just like the reference module.
    v32 = v.astype(jnp.float32)
    sq = jnp.sum(v32 * v32, axis=1, keepdims=True)        # [C, 1]
    scale = g.astype(jnp.float32) * jax.lax.rsqrt(sq)     # [C, 1]
    w_t = (v32 * scale).T                                 # [D, C], MXU-friendly RHS

    # --- Lane-dense class-dim padding + batch tiling. ---
    C_pad = _round_up(C, 128)
    TB = 256 if B >= 256 else _round_up(B, 8)             # batch tile (mult. of 8)
    B_pad = _round_up(B, TB)

    if mxu_dtype is not None:
        x_mm = x.astype(mxu_dtype)
        w_mm = w_t.astype(mxu_dtype)
    else:
        x_mm = x
        w_mm = w_t.astype(x.dtype)

    x_p = jnp.pad(x_mm, ((0, B_pad - B), (0, 0)))
    w_p = jnp.pad(w_mm, ((0, 0), (0, C_pad - C)))
    b_p = jnp.pad(b.astype(jnp.float32).reshape(1, C), ((0, 0), (0, C_pad - C)))

    grid = (B_pad // TB,)
    out_p = pl.pallas_call(
        _sfda_linear_kernel,
        out_shape=jax.ShapeDtypeStruct((B_pad, C_pad), out_dtype),
        grid=grid,
        in_specs=[
            pl.BlockSpec((TB, D), lambda i: (i, 0)),      # x tile (pipelined)
            pl.BlockSpec((D, C_pad), lambda i: (0, 0)),   # weight stays resident
            pl.BlockSpec((1, C_pad), lambda i: (0, 0)),   # bias stays resident
        ],
        out_specs=pl.BlockSpec((TB, C_pad), lambda i: (i, 0)),
        compiler_params=pltpu.CompilerParams(
            # batch tiles are independent -> shard across TensorCores on v7x
            dimension_semantics=("parallel",),
        ),
    )(x_p, w_p, b_p)

    return out_p[:B, :C]


def init_params(key, num_class, bottleneck_dim):
    """Synthetic init mirroring weightNorm(nn.Linear(...)) + init_weights:
    v ~ xavier_normal; g = per-row L2 norm of v (effective W == v at init);
    bias = zeros."""
    std = (2.0 / (bottleneck_dim + num_class)) ** 0.5
    v = std * jax.random.normal(key, (num_class, bottleneck_dim), dtype=jnp.float32)
    g = jnp.sqrt(jnp.sum(v * v, axis=1, keepdims=True))    # [C, 1]
    b = jnp.zeros((num_class,), dtype=jnp.float32)
    return v, g, b


if __name__ == "__main__":
    key = jax.random.PRNGKey(0)
    k_x, k_p = jax.random.split(key)

    batch = 8
    bottleneck_dim = 256
    num_class = 16

    x = jax.random.normal(k_x, (batch, bottleneck_dim), dtype=jnp.float32)
    v, g, b = init_params(k_p, num_class, bottleneck_dim)

    # Reference (plain JAX, same weight-norm semantics).
    w_ref = v * (g / jnp.sqrt(jnp.sum(v * v, axis=1, keepdims=True)))
    ref = x @ w_ref.T + b

    # f32 path: tight check.
    out = jax.block_until_ready(sfda_classifier_forward(x, v, g, b))
    assert out.shape == (batch, num_class)
    assert jnp.allclose(out, ref, atol=1e-4, rtol=1e-4), "f32 path mismatch"

    # bf16-MXU path (fast path on v5e/v6e/v7x): relaxed tolerance.
    out_bf16 = jax.block_until_ready(
        sfda_classifier_forward(x, v, g, b, mxu_dtype=jnp.bfloat16))
    assert out_bf16.shape == (batch, num_class)
    assert jnp.allclose(out_bf16, ref, atol=5e-2, rtol=5e-2), "bf16 path mismatch"

    print("KERNEL_OK")
</pallas_src>

<mosaic_0001>
module attributes {stable_mosaic.version = 11 : i64} {
  func.func @_sfda_linear_kernel(%arg0: i32, %arg1: memref<8x256xf32, #tpu.memory_space<vmem>>, %arg2: memref<256x128xf32, #tpu.memory_space<vmem>>, %arg3: memref<1x128xf32, #tpu.memory_space<vmem>>, %arg4: memref<8x128xf32, #tpu.memory_space<vmem>>) attributes {dimension_semantics = [#tpu.dimension_semantics<parallel>], iteration_bounds = array<i64: 1>, scalar_prefetch = 0 : i64, scratch_operands = 0 : i64, tpu.core_type = #tpu.core_type<tc>, window_params = [{transform_indices = @transform_0, window_bounds = array<i64: 8, 256>}, {pipeline_mode = #tpu.pipeline_mode<synchronous>, transform_indices = @transform_1, window_bounds = array<i64: 256, 128>}, {pipeline_mode = #tpu.pipeline_mode<synchronous>, transform_indices = @transform_2, window_bounds = array<i64: 1, 128>}, {transform_indices = @transform_3, window_bounds = array<i64: 8, 128>}]} {
    %c0 = arith.constant 0 : index
    %c0_0 = arith.constant 0 : index
    %0 = vector.load %arg1[%c0, %c0_0] : memref<8x256xf32, #tpu.memory_space<vmem>>, vector<8x256xf32>
    %c0_1 = arith.constant 0 : index
    %c0_2 = arith.constant 0 : index
    %1 = vector.load %arg2[%c0_1, %c0_2] : memref<256x128xf32, #tpu.memory_space<vmem>>, vector<256x128xf32>
    %cst = arith.constant dense<0.000000e+00> : vector<8x128xf32>
    %2 = tpu.matmul %0, %1, %cst {dimension_numbers = #tpu.dot_dimension_numbers<[1], [0], [0], [1], [0, 0, 1, 1], [], []>} : vector<8x256xf32>, vector<256x128xf32>, vector<8x128xf32> -> vector<8x128xf32>
    %c0_3 = arith.constant 0 : index
    %c0_4 = arith.constant 0 : index
    %3 = vector.load %arg3[%c0_3, %c0_4] : memref<1x128xf32, #tpu.memory_space<vmem>>, vector<1x128xf32>
    %4 = vector.broadcast %3 : vector<1x128xf32> to vector<8x128xf32>
    %5 = arith.addf %2, %4 : vector<8x128xf32>
    %c0_5 = arith.constant 0 : index
    %c0_6 = arith.constant 0 : index
    %6 = vector.load %arg4[%c0_5, %c0_6] : memref<8x128xf32, #tpu.memory_space<vmem>>, vector<8x128xf32>
    tpu.vector_store %arg4[%c0_5, %c0_6], %5 {strides = array<i32>} : memref<8x128xf32, #tpu.memory_space<vmem>>, vector<8x128xf32>,
    return
  }
  func.func @transform_0(%arg0: i32) -> (i32, i32) {
    %c0_i32 = arith.constant 0 : i32
    %c0_i32_0 = arith.constant 0 : i32
    return %arg0, %c0_i32 : i32, i32
  }
  func.func @transform_1(%arg0: i32) -> (i32, i32) {
    %c0_i32 = arith.constant 0 : i32
    %c0_i32_0 = arith.constant 0 : i32
    %c0_i32_1 = arith.constant 0 : i32
    return %c0_i32, %c0_i32_0 : i32, i32
  }
  func.func @transform_2(%arg0: i32) -> (i32, i32) {
    %c0_i32 = arith.constant 0 : i32
    %c0_i32_0 = arith.constant 0 : i32
    %c0_i32_1 = arith.constant 0 : i32
    return %c0_i32, %c0_i32_0 : i32, i32
  }
  func.func @transform_3(%arg0: i32) -> (i32, i32) {
    %c0_i32 = arith.constant 0 : i32
    %c0_i32_0 = arith.constant 0 : i32
    return %arg0, %c0_i32 : i32, i32
  }
}

</mosaic_0001>

<bundles_post_ra>
// kernel: sfda_classifier_forward.1
= control target key start
LH: loop header
LB: loop body
LE: loop exit
PB: predicated region body
PF: predicated region fallthrough
CT: control target
= control target key end

     0   :  { %s267_s0 = inlined_call_operand.vmem [shape: f32[8,256], index: 0, kind: input, shape index: {}]   ;;  %s268_s1 = inlined_call_operand.vmem [shape: f32[256,128], index: 1, kind: input, shape index: {}]   ;;  %s269_s2 = inlined_call_operand.vmem [shape: f32[1,128], index: 2, kind: input, shape index: {}]   ;;  %s270_s3 = inlined_call_operand.hbm [shape: f32[8,128], index: 3, kind: output, shape index: {}]  }
   0x1   :  { %v32_v0 = vld [vmem:[%s268_s1 + $0x78] sm:$0xff]  ;;  %v31_v1 = vld [vmem:[%s268_s1 + $0x70] sm:$0xff]  ;;  %v30_v4 = vld [vmem:[%s268_s1 + $0x68] sm:$0xff] }
   0x2   :  { %v48_v2 = vld [vmem:[%s268_s1 + $0xf8] sm:$0xff]  ;;  %53 = vmatpush.msra.mxu0 %v32_v0  ;;  %v47_v3 = vld [vmem:[%s268_s1 + $0xf0] sm:$0xff]  ;;  %v46_v5 = vld [vmem:[%s268_s1 + $0xe8] sm:$0xff] }
   0x3   :  { %73 = vmatpush.msra.mxu1 %v48_v2  ;;  %v29_v6 = vld [vmem:[%s268_s1 + $0x60] sm:$0xff]  ;;  %v28_v8 = vld [vmem:[%s268_s1 + $0x58] sm:$0xff]  ;;  %v27_v10 = vld [vmem:[%s268_s1 + $0x50] sm:$0xff] }
   0x4   :  { %54 = vmatpush.msra.mxu0 %v31_v1  ;;  %v45_v7 = vld [vmem:[%s268_s1 + $0xe0] sm:$0xff]  ;;  %v44_v9 = vld [vmem:[%s268_s1 + $0xd8] sm:$0xff]  ;;  %v43_v11 = vld [vmem:[%s268_s1 + $0xd0] sm:$0xff] }
   0x5   :  { %74 = vmatpush.msra.mxu1 %v47_v3  ;;  %v26_v12 = vld [vmem:[%s268_s1 + $0x48] sm:$0xff]  ;;  %v25_v14 = vld [vmem:[%s268_s1 + $0x40] sm:$0xff] }
   0x6   :  { %55 = vmatpush.msra.mxu0 %v30_v4  ;;  %v42_v13 = vld [vmem:[%s268_s1 + $0xc8] sm:$0xff]  ;;  %v41_v15 = vld [vmem:[%s268_s1 + $0xc0] sm:$0xff] }
   0x7   :  { %75 = vmatpush.msra.mxu1 %v46_v5 }
   0x8   :  { %56 = vmatpush.msra.mxu0 %v29_v6 }
   0x9   :  { %76 = vmatpush.msra.mxu1 %v45_v7 }
   0xa   :  { %57 = vmatpush.msra.mxu0 %v28_v8 }
   0xb   :  { %77 = vmatpush.msra.mxu1 %v44_v9 }
   0xc   :  { %58 = vmatpush.msra.mxu0 %v27_v10 }
   0xd   :  { %78 = vmatpush.msra.mxu1 %v43_v11 }
   0xe   :  { %8 = vsyncpa [#allocation3], 0  ;;  %59 = vmatpush.msra.mxu0 %v26_v12  ;;  %v24_v16 = vld [vmem:[%s268_s1 + $0x38] sm:$0xff]  ;;  %v23_v18 = vld [vmem:[%s268_s1 + $0x30] sm:$0xff]  ;;  %s101_s4 = sshll.u32 %s270_s3, 4  ;;  %s102_s4 = int_to_ptr.hbm [resolvable:$true] %s101_s4 }
   0xf   :  { %79 = vmatpush.msra.mxu1 %v42_v13  ;;  %v40_v17 = vld [vmem:[%s268_s1 + $0xb8] sm:$0xff]  ;;  %v39_v19 = vld [vmem:[%s268_s1 + $0xb0] sm:$0xff]  ;;  %v22_v20 = vld [vmem:[%s268_s1 + $0x28] sm:$0xff] }
  0x10   :  { %60 = vmatpush.msra.mxu0 %v25_v14  ;;  %v38_v21 = vld [vmem:[%s268_s1 + $0xa8] sm:$0xff]  ;;  %v21_v22 = vld [vmem:[%s268_s1 + $0x20] sm:$0xff]  ;;  %v20_v24 = vld [vmem:[%s268_s1 + $0x18] sm:$0xff] }
  0x11   :  { %80 = vmatpush.msra.mxu1 %v41_v15  ;;  %v37_v23 = vld [vmem:[%s268_s1 + $0xa0] sm:$0xff]  ;;  %v36_v25 = vld [vmem:[%s268_s1 + $0x98] sm:$0xff]  ;;  %v19_v26 = vld [vmem:[%s268_s1 + $0x10] sm:$0xff] }
  0x12   :  { %61 = vmatpush.msra.mxu0 %v24_v16  ;;  %v35_v27 = vld [vmem:[%s268_s1 + $0x90] sm:$0xff]  ;;  %v18_v28 = vld [vmem:[%s268_s1 + $0x8] sm:$0xff]  ;;  %v17_v30 = vld [vmem:[%s268_s1] sm:$0xff] }
  0x13   :  { %81 = vmatpush.msra.mxu1 %v40_v17  ;;  %v34_v29 = vld [vmem:[%s268_s1 + $0x88] sm:$0xff]  ;;  %v33_v31 = vld [vmem:[%s268_s1 + $0x80] sm:$0xff]  ;;  %s138_s1 = smov [#allocation2]  }
  0x14   :  { %62 = vmatpush.msra.mxu0 %v23_v18  ;;  %v15_v32 = vld [vmem:[%s267_s0] sm:$0xff]  ;;  %v16_v33 = vld [vmem:[%s267_s0 + $0x8] sm:$0xff]  ;;  %s99_s28 = sshll.u32 %s138_s1, 4  ;;  %s100_s28 = int_to_ptr.vmem [resolvable:$true] %s99_s28 }
  0x15   :  { %82 = vmatpush.msra.mxu1 %v39_v19  ;;  %v111_v34 = vld [vmem:[%s269_s2] ss:$0 sm:$0xff] }
  0x16   :  { %63 = vmatpush.msra.mxu0 %v22_v20 }
  0x17   :  { %83 = vmatpush.msra.mxu1 %v38_v21 }
  0x18   :  { %64 = vmatpush.msra.mxu0 %v21_v22 }
  0x19   :  { %84 = vmatpush.msra.mxu1 %v37_v23 }
  0x1a   :  { %65 = vmatpush.msra.mxu0 %v20_v24 }
  0x1b   :  { %85 = vmatpush.msra.mxu1 %v36_v25 }
  0x1c   :  { %66 = vmatpush.msra.mxu0 %v19_v26 }
  0x1d   :  { %86 = vmatpush.msra.mxu1 %v35_v27 }
  0x1e   :  { %67 = vmatpush.msra.mxu0 %v18_v28 }
  0x1f   :  { %87 = vmatpush.msra.mxu1 %v34_v29 }
  0x20   :  { %68 = vmatpush.msra.mxu0 %v17_v30 }
  0x21   :  { %88 = vmatpush.msra.mxu1 %v33_v31  ;;  %69 = vmatmul.f32.vlgmr.msra.gmra.mxu0 %v15_v32 }
  0x22   :  { %89 = vmatmul.f32.vlgmr.msra.gmra.mxu1 %v16_v33 }
  0x9e   :  { %v70_v35 = vpop.f32.mrf.mxu0 }
  0x9f   :  { %v90_v36 = vpop.f32.mrf.mxu1  ;;  %v71_v37 = vadd.f32 %v111_v34, %v70_v35 }
  0xa1   :  { %v91_v38 = vadd.f32 %v90_v36, %v71_v37 }
  0xa3   :  { %93 = vst [vmem:[#allocation2] sm:$0xff] %v91_v38 }
  0xa4   :  { %104 = dma.vmem_to_hbm [thread:$0]  %s100_s28, 128, %s102_s4, [#allocation3]  }
  0xa5   :  { %136 = dma.done.wait [#allocation3], 128  }
  0xa6   :  { %137 = vsyncadd [#allocation3], 4294967168 }
  0xa7   :  { %109 = vsyncpa [#allocation3], 1 }

</bundles_post_ra>
